<compile_context>
chip_gen: v7x
topology: tpu7x:2x2x1
jax: 0.10.0
libtpu: 0.0.40
codegen_flags: <defaults>
</compile_context>

<pallas_src>
import functools
import math

import jax
import jax.numpy as jnp
from jax.experimental import pallas as pl
from jax.experimental.pallas import tpu as pltpu

RESIZE_TARGET = 16   # stand-in for the module's hard-coded 224 at synthetic scale
LANE = 128
BN_EPS = 1e-5


def _round_up(n, m):
    return ((n + m - 1) // m) * m


def _auto_batch_tile(batch, channels, hw, itemsize, target_bytes=2 << 20):
    """Pick a batch tile: sublane-legal blocks, ~target_bytes per input block, and
    >=2 grid steps when possible (v7x has 2 TensorCores)."""
    best_key, best_bt = None, batch
    for bt in range(1, batch + 1):
        if batch % bt:
            continue
        # (8,128) rule: second-minor block dims (bt for the output, bt*C for the folded
        # image) must be a multiple of 8 unless they span the full array dimension.
        if bt % 8 != 0 and bt != batch:
            continue
        blk = bt * channels * hw * itemsize
        key = (blk <= target_bytes,                       # prefer blocks within budget
               (batch // bt) >= 2,                        # prefer >=2 grid steps (v7x 2 TCs)
               blk if blk <= target_bytes else -blk)      # biggest fitting / smallest overflow
        if best_key is None or key > best_key:
            best_key, best_bt = key, bt
    return best_bt


# ---------------- kernel A (C <= 8): fused scale/trunc + GAP + tiny projection ----------------
def _backbone_smallc_kernel(x_ref, w_ref, sel_ref, b_ref, o_ref, *, apply_scale, hw):
    # x_ref:   (bt*C, hw)       batch & channel folded into the sublane axis (dense vregs)
    # w_ref:   (bt*C, outdim_p) per-row weight (w tiled over the bt batches), VMEM resident
    # sel_ref: (bt, bt*C)       group-sum selection matrix, VMEM resident
    # b_ref:   (1, outdim_p)
    # o_ref:   (bt, outdim_p)   lane- and (when bt>=8) sublane-dense output slab
    xf = x_ref[...].astype(jnp.float32)
    if apply_scale:
        # torch: x *= 255 ; x = x.int()   (truncation toward zero, exact in f32)
        xf = jnp.trunc(xf * 255.0)
    # Synthetic R3M backbone: global average pool == one lane-axis reduction per row.
    pooled = jnp.sum(xf, axis=-1, keepdims=True) * (1.0 / hw)          # (bt*C, 1)
    prod = pooled * w_ref[...]                                         # (bt*C, outdim_p)
    # Re-fold the C channel rows of every batch with one tiny MXU matmul: no per-channel
    # slicing / broadcast loop, no sublane reshapes, and the MXU is otherwise idle.
    feat = jnp.dot(sel_ref[...], prod, preferred_element_type=jnp.float32)  # (bt, outdim_p)
    o_ref[...] = feat + b_ref[...]


# ---------------- kernel A' (C > 8): GAP + bf16 projection (sublanes already dense) -----------
def _backbone_bigc_kernel(x_ref, w_ref, b_ref, o_ref, *, apply_scale, hw):
    xf = x_ref[...].astype(jnp.float32)                                # (bt, C, hw)
    if apply_scale:
        xf = jnp.trunc(xf * 255.0)
    pooled = jnp.sum(xf, axis=-1) * (1.0 / hw)                         # (bt, C)
    # TODO(synk): at real R3M scale (C ~ outdim ~ 2048) this should become a K/N-tiled MXU
    #             matmul grid with an f32 VMEM accumulator; single bf16 dot stand-in here.
    feat = jnp.dot(pooled.astype(w_ref.dtype), w_ref[...],
                   preferred_element_type=jnp.float32)                 # (bt, outdim_p)
    o_ref[...] = feat + b_ref[...]


def backbone(x, w_p, b_p, *, apply_scale, batch_tile=None):
    B, C, H, W = x.shape
    hw = H * W
    outdim_p = w_p.shape[1]
    itemsize = jnp.dtype(x.dtype).itemsize
    bt = _auto_batch_tile(B, C, hw, itemsize) if batch_tile is None else batch_tile
    assert B % bt == 0 and (bt % 8 == 0 or bt == B), (B, C, bt)

    # Whole-array VMEM residents: single copy, never double-buffered across the grid.
    resident = pl.BlockSpec(memory_space=pltpu.MemorySpace.VMEM)
    in_blk = bt * C * hw * itemsize
    out_blk = bt * outdim_p * 4

    if C <= 8:
        # Fold batch+channel into the sublane axis so the dominant H*W reduction runs on
        # sublane-dense (8,128) vregs; un-fold afterwards with the selection matmul.
        x_in = x.reshape(B * C, hw)
        w_tile = jnp.tile(w_p, (bt, 1))                                 # (bt*C, outdim_p)
        sel = jnp.kron(jnp.eye(bt, dtype=jnp.float32),
                       jnp.ones((1, C), jnp.float32))                   # (bt, bt*C)
        operands = (x_in, w_tile, sel, b_p)
        in_specs = [pl.BlockSpec((bt * C, hw), lambda i: (i, 0)),
                    resident, resident, resident]
        kernel = functools.partial(_backbone_smallc_kernel,
                                   apply_scale=apply_scale, hw=hw)
        resident_bytes = (w_tile.size + sel.size + b_p.size) * 4
    else:
        x_in = x.reshape(B, C, hw)
        w_bf16 = w_p.astype(jnp.bfloat16)                               # halves weight DMA/VMEM
        operands = (x_in, w_bf16, b_p)
        in_specs = [pl.BlockSpec((bt, C, hw), lambda i: (i, 0, 0)),
                    resident, resident]
        kernel = functools.partial(_backbone_bigc_kernel,
                                   apply_scale=apply_scale, hw=hw)
        resident_bytes = w_bf16.size * 2 + b_p.size * 4

    # Explicit VMEM budget: double-buffered image + output blocks, single-copy residents,
    # 2x headroom; floor covers v5e's 16 MiB scoped default, cap keeps v7x (64 MiB) safe.
    vmem_limit = int(min(max(2 * (2 * in_blk + 2 * out_blk + resident_bytes), 16 << 20),
                         48 << 20))

    return pl.pallas_call(
        kernel,
        grid=(B // bt,),
        in_specs=in_specs,
        out_specs=pl.BlockSpec((bt, outdim_p), lambda i: (i, 0)),
        out_shape=jax.ShapeDtypeStruct((B, outdim_p), jnp.float32),
        compiler_params=pltpu.CompilerParams(
            dimension_semantics=("parallel",),
            vmem_limit_bytes=vmem_limit),
    )(*operands)


# ------------- kernel B: BatchNorm1d (training-mode stats), tiled over outdim columns ---------
def _bn_kernel(feat_ref, gamma_ref, beta_ref, o_ref):
    feat = feat_ref[...]                                 # (B, col_tile)
    mean = jnp.mean(feat, axis=0, keepdims=True)
    diff = feat - mean
    var = jnp.mean(diff * diff, axis=0, keepdims=True)   # biased variance (training mode)
    o_ref[...] = gamma_ref[...] * (diff * jax.lax.rsqrt(var + BN_EPS)) + beta_ref[...]


def batchnorm1d(feat, gamma_p, beta_p, *, col_tile=None):
    B, outdim_p = feat.shape
    if col_tile is None:
        col_tile = math.gcd(outdim_p, 512)               # multiple of 128, divides outdim_p
    return pl.pallas_call(
        _bn_kernel,
        grid=(outdim_p // col_tile,),
        in_specs=[pl.BlockSpec((B, col_tile), lambda j: (0, j)),
                  pl.BlockSpec((1, col_tile), lambda j: (0, j)),
                  pl.BlockSpec((1, col_tile), lambda j: (0, j))],
        out_specs=pl.BlockSpec((B, col_tile), lambda j: (0, j)),
        out_shape=jax.ShapeDtypeStruct((B, outdim_p), jnp.float32),
        compiler_params=pltpu.CompilerParams(dimension_semantics=("parallel",)),
    )(feat, gamma_p, beta_p)


# ------------------------------------- module glue -------------------------------------------
def init_params(key, in_channels, outdim):
    w = jax.random.normal(key, (in_channels, outdim), jnp.float32) * 0.1
    b = jnp.zeros((1, outdim), jnp.float32)
    gamma = jnp.ones((1, outdim), jnp.float32)           # BatchNorm1d weight init
    beta = jnp.zeros((1, outdim), jnp.float32)           # BatchNorm1d bias init
    return {"w": w, "b": b, "gamma": gamma, "beta": beta}


@jax.jit
def r3m_module_forward(x, params):
    B, C, H, W = x.shape
    outdim = params["w"].shape[1]
    outdim_p = _round_up(outdim, LANE)
    pad = outdim_p - outdim

    # Lane-dense (multiple-of-128) kernel parameters; padded columns stay exactly zero
    # through the projection and BatchNorm, then get sliced off.
    w_p = jnp.pad(params["w"], ((0, 0), (0, pad)))
    b_p = jnp.pad(params["b"], ((0, 0), (0, pad)))
    gamma_p = jnp.pad(params["gamma"], ((0, 0), (0, pad)), constant_values=1.0)
    beta_p = jnp.pad(params["beta"], ((0, 0), (0, pad)))

    if H != RESIZE_TARGET or W != RESIZE_TARGET:
        # torch order: x *= 255 ; x = x.int() ; torchvision Resize(target).
        # Plain XLA here: the scale/trunc fuses into the resize (no extra image-sized
        # HBM round trip, no extra pallas_call).
        xi = jnp.trunc(x * 255.0)
        # TODO(synk): torchvision's antialiased bilinear Resize is not replicated bit-exactly.
        xi = jax.image.resize(xi, (B, C, RESIZE_TARGET, RESIZE_TARGET), method="bilinear")
        xi = jnp.round(xi)
        # 0..255 integers are exact in bf16 -> halve the backbone's HBM read bytes.
        xi = xi.astype(jnp.bfloat16)
        feat = backbone(xi, w_p, b_p, apply_scale=False)
    else:
        # No resize: fuse x*255 -> trunc directly into the backbone kernel (no image-sized
        # intermediate); keep the f32 read so the [0,1] inputs stay exact.
        feat = backbone(x, w_p, b_p, apply_scale=True)

    out_p = batchnorm1d(feat, gamma_p, beta_p)
    # TODO(synk): BatchNorm1d running_mean/running_var updates (used only in eval mode) not modeled.
    return out_p[:, :outdim]


if __name__ == "__main__":
    key = jax.random.PRNGKey(0)
    kx, kw = jax.random.split(key)

    B, C, H, W = 2, 4, 16, 16
    OUTDIM = 32   # stand-in for R3M_obj.outdim (e.g. 2048 for resnet50)

    x = jax.random.uniform(kx, (B, C, H, W), dtype=jnp.float32)   # image in [0, 1]
    params = init_params(kw, C, OUTDIM)

    out = jax.block_until_ready(r3m_module_forward(x, params))

    assert out.shape == (B, OUTDIM), out.shape
    assert out.dtype == jnp.float32
    print("KERNEL_OK")
</pallas_src>

<mosaic_0001>
module attributes {stable_mosaic.version = 11 : i64} {
  func.func @_bn_kernel(%arg0: i32, %arg1: memref<2x128xf32, #tpu.memory_space<vmem>>, %arg2: memref<1x128xf32, #tpu.memory_space<vmem>>, %arg3: memref<1x128xf32, #tpu.memory_space<vmem>>, %arg4: memref<2x128xf32, #tpu.memory_space<vmem>>) attributes {dimension_semantics = [#tpu.dimension_semantics<parallel>], iteration_bounds = array<i64: 1>, scalar_prefetch = 0 : i64, scratch_operands = 0 : i64, tpu.core_type = #tpu.core_type<tc>, window_params = [{transform_indices = @transform_0, window_bounds = array<i64: 2, 128>}, {transform_indices = @transform_1, window_bounds = array<i64: 1, 128>}, {transform_indices = @transform_2, window_bounds = array<i64: 1, 128>}, {transform_indices = @transform_3, window_bounds = array<i64: 2, 128>}]} {
    %c0 = arith.constant 0 : index
    %c0_0 = arith.constant 0 : index
    %0 = vector.load %arg1[%c0, %c0_0] : memref<2x128xf32, #tpu.memory_space<vmem>>, vector<2x128xf32>
    %cst = arith.constant dense<0.000000e+00> : vector<128xf32>
    %1 = vector.multi_reduction <add>, %0, %cst [0] : vector<2x128xf32> to vector<128xf32>
    %2 = vector.shape_cast %1 : vector<128xf32> to vector<1x128xf32>
    %cst_1 = arith.constant 2.000000e+00 : f32
    %3 = vector.broadcast %cst_1 : f32 to vector<1x128xf32>
    %4 = arith.divf %2, %3 : vector<1x128xf32>
    %5 = vector.broadcast %4 : vector<1x128xf32> to vector<2x128xf32>
    %6 = arith.subf %0, %5 : vector<2x128xf32>
    %7 = arith.mulf %6, %6 : vector<2x128xf32>
    %cst_2 = arith.constant dense<0.000000e+00> : vector<128xf32>
    %8 = vector.multi_reduction <add>, %7, %cst_2 [0] : vector<2x128xf32> to vector<128xf32>
    %9 = vector.shape_cast %8 : vector<128xf32> to vector<1x128xf32>
    %cst_3 = arith.constant 2.000000e+00 : f32
    %10 = vector.broadcast %cst_3 : f32 to vector<1x128xf32>
    %11 = arith.divf %9, %10 : vector<1x128xf32>
    %c0_4 = arith.constant 0 : index
    %c0_5 = arith.constant 0 : index
    %12 = vector.load %arg2[%c0_4, %c0_5] : memref<1x128xf32, #tpu.memory_space<vmem>>, vector<1x128xf32>
    %cst_6 = arith.constant 9.99999974E-6 : f32
    %13 = vector.broadcast %cst_6 : f32 to vector<1x128xf32>
    %14 = arith.addf %11, %13 : vector<1x128xf32>
    %15 = math.rsqrt %14 : vector<1x128xf32>
    %16 = vector.broadcast %15 : vector<1x128xf32> to vector<2x128xf32>
    %17 = arith.mulf %6, %16 : vector<2x128xf32>
    %18 = vector.broadcast %12 : vector<1x128xf32> to vector<2x128xf32>
    %19 = arith.mulf %18, %17 : vector<2x128xf32>
    %c0_7 = arith.constant 0 : index
    %c0_8 = arith.constant 0 : index
    %20 = vector.load %arg3[%c0_7, %c0_8] : memref<1x128xf32, #tpu.memory_space<vmem>>, vector<1x128xf32>
    %21 = vector.broadcast %20 : vector<1x128xf32> to vector<2x128xf32>
    %22 = arith.addf %19, %21 : vector<2x128xf32>
    %c0_9 = arith.constant 0 : index
    %c0_10 = arith.constant 0 : index
    %23 = vector.load %arg4[%c0_9, %c0_10] : memref<2x128xf32, #tpu.memory_space<vmem>>, vector<2x128xf32>
    tpu.vector_store %arg4[%c0_9, %c0_10], %22 {strides = array<i32>} : memref<2x128xf32, #tpu.memory_space<vmem>>, vector<2x128xf32>,
    return
  }
  func.func @transform_0(%arg0: i32) -> (i32, i32) {
    %c0_i32 = arith.constant 0 : i32
    %c0_i32_0 = arith.constant 0 : i32
    return %c0_i32, %arg0 : i32, i32
  }
  func.func @transform_1(%arg0: i32) -> (i32, i32) {
    %c0_i32 = arith.constant 0 : i32
    %c0_i32_0 = arith.constant 0 : i32
    return %c0_i32, %arg0 : i32, i32
  }
  func.func @transform_2(%arg0: i32) -> (i32, i32) {
    %c0_i32 = arith.constant 0 : i32
    %c0_i32_0 = arith.constant 0 : i32
    return %c0_i32, %arg0 : i32, i32
  }
  func.func @transform_3(%arg0: i32) -> (i32, i32) {
    %c0_i32 = arith.constant 0 : i32
    %c0_i32_0 = arith.constant 0 : i32
    return %c0_i32, %arg0 : i32, i32
  }
}

module attributes {stable_mosaic.version = 11 : i64} {
  func.func @_backbone_smallc_kernel(%arg0: i32, %arg1: memref<8x256xf32, #tpu.memory_space<vmem>>, %arg2: memref<8x128xf32, #tpu.memory_space<vmem>>, %arg3: memref<2x8xf32, #tpu.memory_space<vmem>>, %arg4: memref<1x128xf32, #tpu.memory_space<vmem>>, %arg5: memref<2x128xf32, #tpu.memory_space<vmem>>) attributes {dimension_semantics = [#tpu.dimension_semantics<parallel>], iteration_bounds = array<i64: 1>, scalar_prefetch = 0 : i64, scratch_operands = 0 : i64, tpu.core_type = #tpu.core_type<tc>, window_params = [{transform_indices = @transform_0, window_bounds = array<i64: 8, 256>}, {pipeline_mode = #tpu.pipeline_mode<synchronous>, transform_indices = @transform_1, window_bounds = array<i64: 8, 128>}, {pipeline_mode = #tpu.pipeline_mode<synchronous>, transform_indices = @transform_2, window_bounds = array<i64: 2, 8>}, {pipeline_mode = #tpu.pipeline_mode<synchronous>, transform_indices = @transform_3, window_bounds = array<i64: 1, 128>}, {transform_indices = @transform_4, window_bounds = array<i64: 2, 128>}]} {
    %c0 = arith.constant 0 : index
    %c0_0 = arith.constant 0 : index
    %0 = vector.load %arg1[%c0, %c0_0] : memref<8x256xf32, #tpu.memory_space<vmem>>, vector<8x256xf32>
    %cst = arith.constant 2.550000e+02 : f32
    %1 = vector.broadcast %cst : f32 to vector<8x256xf32>
    %2 = arith.mulf %0, %1 : vector<8x256xf32>
    %cst_1 = arith.constant 0.000000e+00 : f32
    %3 = vector.broadcast %cst_1 : f32 to vector<8x256xf32>
    %4 = arith.cmpf olt, %2, %3 : vector<8x256xf32>
    %5 = math.ceil %2 : vector<8x256xf32>
    %6 = math.floor %2 : vector<8x256xf32>
    %7 = arith.select %4, %5, %6 : vector<8x256xi1>, vector<8x256xf32>
    %cst_2 = arith.constant dense<0.000000e+00> : vector<8xf32>
    %8 = vector.multi_reduction <add>, %7, %cst_2 [1] : vector<8x256xf32> to vector<8xf32>
    %9 = vector.shape_cast %8 : vector<8xf32> to vector<8x1xf32>
    %cst_3 = arith.constant 3.906250e-03 : f32
    %10 = vector.broadcast %cst_3 : f32 to vector<8x1xf32>
    %11 = arith.mulf %9, %10 : vector<8x1xf32>
    %c0_4 = arith.constant 0 : index
    %c0_5 = arith.constant 0 : index
    %12 = vector.load %arg2[%c0_4, %c0_5] : memref<8x128xf32, #tpu.memory_space<vmem>>, vector<8x128xf32>
    %13 = vector.broadcast %11 : vector<8x1xf32> to vector<8x128xf32>
    %14 = arith.mulf %13, %12 : vector<8x128xf32>
    %c0_6 = arith.constant 0 : index
    %c0_7 = arith.constant 0 : index
    %15 = vector.load %arg3[%c0_6, %c0_7] : memref<2x8xf32, #tpu.memory_space<vmem>>, vector<2x8xf32>
    %cst_8 = arith.constant dense<0.000000e+00> : vector<2x128xf32>
    %16 = tpu.matmul %15, %14, %cst_8 {dimension_numbers = #tpu.dot_dimension_numbers<[1], [0], [0], [1], [0, 0, 1, 1], [], []>} : vector<2x8xf32>, vector<8x128xf32>, vector<2x128xf32> -> vector<2x128xf32>
    %c0_9 = arith.constant 0 : index
    %c0_10 = arith.constant 0 : index
    %17 = vector.load %arg4[%c0_9, %c0_10] : memref<1x128xf32, #tpu.memory_space<vmem>>, vector<1x128xf32>
    %18 = vector.broadcast %17 : vector<1x128xf32> to vector<2x128xf32>
    %19 = arith.addf %16, %18 : vector<2x128xf32>
    %c0_11 = arith.constant 0 : index
    %c0_12 = arith.constant 0 : index
    %20 = vector.load %arg5[%c0_11, %c0_12] : memref<2x128xf32, #tpu.memory_space<vmem>>, vector<2x128xf32>
    tpu.vector_store %arg5[%c0_11, %c0_12], %19 {strides = array<i32>} : memref<2x128xf32, #tpu.memory_space<vmem>>, vector<2x128xf32>,
    return
  }
  func.func @transform_0(%arg0: i32) -> (i32, i32) {
    %c0_i32 = arith.constant 0 : i32
    %c0_i32_0 = arith.constant 0 : i32
    return %arg0, %c0_i32 : i32, i32
  }
  func.func @transform_1(%arg0: i32) -> (i32, i32) {
    %c0_i32 = arith.constant 0 : i32
    %c0_i32_0 = arith.constant 0 : i32
    %c0_i32_1 = arith.constant 0 : i32
    return %c0_i32, %c0_i32_0 : i32, i32
  }
  func.func @transform_2(%arg0: i32) -> (i32, i32) {
    %c0_i32 = arith.constant 0 : i32
    %c0_i32_0 = arith.constant 0 : i32
    %c0_i32_1 = arith.constant 0 : i32
    return %c0_i32, %c0_i32_0 : i32, i32
  }
  func.func @transform_3(%arg0: i32) -> (i32, i32) {
    %c0_i32 = arith.constant 0 : i32
    %c0_i32_0 = arith.constant 0 : i32
    %c0_i32_1 = arith.constant 0 : i32
    return %c0_i32, %c0_i32_0 : i32, i32
  }
  func.func @transform_4(%arg0: i32) -> (i32, i32) {
    %c0_i32 = arith.constant 0 : i32
    %c0_i32_0 = arith.constant 0 : i32
    return %arg0, %c0_i32 : i32, i32
  }
}

</mosaic_0001>

<bundles_post_ra>
// kernel: r3m_module_forward.2
= control target key start
LH: loop header
LB: loop body
LE: loop exit
PB: predicated region body
PF: predicated region fallthrough
CT: control target
= control target key end

     0   :  { %v133_v11 = vmov 0.0   ;;  %vm134_vm2 = vmmov 0   ;;  %vm43_vm3 = vcmask 64512   ;;  %s178_s0 = inlined_call_operand.vmem [shape: f32[8,256], index: 0, kind: input, shape index: {}]   ;;  %s179_s1 = inlined_call_operand.vmem [shape: f32[8,128], index: 1, kind: input, shape index: {}]   ;;  %s180_s2 = inlined_call_operand.vmem [shape: f32[2,8], index: 2, kind: input, shape index: {}]   ;;  %s181_s3 = inlined_call_operand.vmem [shape: f32[1,128], index: 3, kind: input, shape index: {}]   ;;  %s182_s4 = inlined_call_operand.vmem [shape: f32[2,128], index: 4, kind: output, shape index: {}]  }
   0x1   :  { %v17_v0 = vld [vmem:[%s178_s0] sm:$0xff]  ;;  %v18_v1 = vld [vmem:[%s178_s0 + $0x8] sm:$0xff]  ;;  %126 = vmatprep.subr.mxu0 %v133_v11  ;;  %128 = vmatprep.mubr.msk.f32.mxu0 %vm134_vm2, %v133_v11 }
   0x2   :  { %v19_v2 = vmul.f32 255.0, %v17_v0  ;;  %v20_v3 = vmul.f32 255.0, %v18_v1  ;;  %v33_v13 = vld [vmem:[%s179_s1] sm:$0xff] }
   0x3   :  { %v35_v16 = vld [vmem:[%s180_s2] sm:$0x3] }
   0x4   :  { %vm21_vm0 = vcmp.lt.f32.partialorder %v19_v2, 0.0  ;;  %vm22_vm1 = vcmp.lt.f32.partialorder %v20_v3, 0.0  ;;  %v23_v4 = vceil.f32 %v19_v2  ;;  %v24_v5 = vceil.f32 %v20_v3  ;;  %v122_v17 = vld [vmem:[%s181_s3] ss:$0 sm:$0xff] }
   0x5   :  { %v25_v6 = vfloor.f32 %v19_v2  ;;  %v26_v7 = vfloor.f32 %v20_v3 }
   0x7   :  { %v27_v8 = vsel %vm21_vm0, %v23_v4, %v25_v6  ;;  %v28_v9 = vsel %vm22_vm1, %v24_v5, %v26_v7 }
   0x8   :  { %v29_v10 = vadd.f32 %v28_v9, %v27_v8 }
   0xa   :  { %30 = vadd.xlane.f32.xlu0 %v29_v10 }
  0x97   :  { %v31_v12 = vpop.xlane.xlu0 %30 }
  0x98   :  { %v32_v14 = vmul.f32 0.00390625, %v31_v12 }
  0x9a   :  { %v34_v15 = vmul.f32 %v33_v13, %v32_v14 }
  0x9c   :  { %127 = vmatpush3.msra.mxu0 %v34_v15 }
  0x9d   :  { %129 = vmatmul.mubr.msk.f32.vlgmr.msra.gmra.mrb[0].mxu0 %vm43_vm3, %v35_v16 }
 0x170   :  { %v113_v18 = vpop.f32.mrb[0].mxu0 }
 0x171   :  { %v114_v19 = vadd.f32 %v122_v17, %v113_v18  ;;  %v130_v20 = vpop.f32.mrb[1].mxu0 }
 0x173   :  { %117 = vst [vmem:[%s182_s4] sm:$0x3] %v114_v19 }

// kernel: r3m_module_forward.3
= control target key start
LH: loop header
LB: loop body
LE: loop exit
PB: predicated region body
PF: predicated region fallthrough
CT: control target
= control target key end

     0   :  { %vm16_vm0 = vcmask 1041408   ;;  %s141_s0 = inlined_call_operand.vmem [shape: f32[2,128], index: 0, kind: input, shape index: {}]   ;;  %s142_s1 = inlined_call_operand.vmem [shape: f32[1,128], index: 1, kind: input, shape index: {}]   ;;  %s143_s2 = inlined_call_operand.vmem [shape: f32[1,128], index: 2, kind: input, shape index: {}]   ;;  %s144_s3 = inlined_call_operand.hbm [shape: f32[2,128], index: 3, kind: output, shape index: {}]  }
   0x1   :  { %v15_v0 = vld [vmem:[%s141_s0] sm:$0x3] }
   0x2   :  { %v17_v1 = vsel %vm16_vm0, %v15_v0, 0.0 }
   0x3   :  { %8 = vsyncpa [#allocation3], 0  ;;  %v18_v2 = vrot.slane %v17_v1, 4  ;;  %v70_v21 = vld [vmem:[%s142_s1] ss:$0 sm:$0xff]  ;;  %s99_s17 = smov [#allocation2]  }
   0x4   :  { %v71_v23 = vld [vmem:[%s143_s2] ss:$0 sm:$0xff]  ;;  %s62_s18 = sshll.u32 %s99_s17, 4  ;;  %s63_s18 = int_to_ptr.vmem [resolvable:$true] %s62_s18 }
   0x5   :  { %v19_v3 = vadd.f32 %v18_v2, %v17_v1  ;;  %s75_s19 = scalar_lea.vmem %s63_s18, 32  ;;  %p80_p1 = scmp.lt.s32.totalorder %s63_s18, %s63_s18 }
   0x6   :  { %p76_p0 = scmp.ne.s32.totalorder %s63_s18, %s75_s19  ;;  %p81_p2 = scmp.lt.s32.totalorder %s75_s19, %s75_s19 }
   0x7   :  { %v20_v4 = vrot.slane %v19_v3, 2 }
   0x8   :  { %p82_p3 = por %p81_p2, %p80_p1 }
   0x9   :  { %v21_v5 = vadd.f32 %v20_v4, %v19_v3 }
   0xa   :  { %p83_p4 = pnand %p82_p3, %p76_p0 }
   0xb   :  { %v22_v6 = vrot.slane %v21_v5, 1 }
   0xd   :  { %v23_v7 = vadd.f32 %v22_v6, %v21_v5 }
   0xf   :  { %v25_v8 = vmul.f32 0.5, %v23_v7 }
  0x11   :  { %v26_v9 = vsub.f32 %v15_v0, %v25_v8 }
  0x13   :  { %v27_v10 = vmul.f32 %v26_v9, %v26_v9 }
  0x15   :  { %v28_v11 = vsel %vm16_vm0, %v27_v10, 0.0 }
  0x16   :  { %v29_v12 = vrot.slane %v28_v11, 4 }
  0x18   :  { %v30_v13 = vadd.f32 %v29_v12, %v28_v11 }
  0x1a   :  { %v31_v14 = vrot.slane %v30_v13, 2 }
  0x1c   :  { %v32_v15 = vadd.f32 %v31_v14, %v30_v13 }
  0x1e   :  { %v33_v16 = vrot.slane %v32_v15, 1 }
  0x20   :  { %v34_v17 = vadd.f32 %v33_v16, %v32_v15 }
  0x22   :  { %v35_v18 = vmul.f32 0.5, %v34_v17 }
  0x24   :  { %v37_v19 = vadd.f32 1e-05, %v35_v18 }
  0x26   :  { %73 = vrsqrt.f32 %v37_v19 }
  0x30   :  { %v74_v20 = vpop.eup %73 }
  0x31   :  { %v39_v22 = vmul.f32 %v74_v20, %v26_v9 }
  0x33   :  { %v46_v24 = vmul.f32 %v70_v21, %v39_v22 }
  0x35   :  { %v54_v25 = vadd.f32 %v71_v23, %v46_v24 }
  0x37   :  { %55 = vst [vmem:[#allocation2] sm:$0x3] %v54_v25 }
  0x38   :  { %86 = shalt.err (!%p83_p4)
}
  0x39   :  { %s87_s21 = scalar_lea.hbm %s144_s3, 32 }
  0x3a   :  { %p88_p5 = scmp.ne.s32.totalorder %s144_s3, %s87_s21  ;;  %p91_p6 = scmp.lt.u32.totalorder %s87_s21, %s144_s3 }
  0x3c   :  { %p93_p7 = pnand %p91_p6, %p88_p5 }
  0x3e   :  { %96 = shalt.err (!%p93_p7)
}
  0x3f   :  { %65 = dma.vmem_to_hbm [thread:$0]  %s63_s18, 32, %s144_s3, [#allocation3]  }
  0x40   :  { %97 = dma.done.wait [#allocation3], 32  }
  0x41   :  { %98 = vsyncadd [#allocation3], 4294967264 }
  0x42   :  { %69 = vsyncpa [#allocation3], 1 }

</bundles_post_ra>
